<compile_context>
chip_gen: v5e
topology: v5e:2x2
jax: 0.10.0
libtpu: 0.0.40
codegen_flags: <defaults>
</compile_context>

<pallas_src>
import math
import jax
import jax.numpy as jnp
from jax.experimental import pallas as pl
from jax.experimental.pallas import tpu as pltpu

_LANE = 128     # lane width: hidden dim is padded to this (VMEM-internal only)
_SUBLANE = 8    # sublane granularity for the batch tile


def _round_up(x: int, m: int) -> int:
    return ((x + m - 1) // m) * m


def _mlp_kernel(x_ref, w1_ref, b1_ref, w2_ref, b2_ref, w3_ref, b3_ref, o_ref):
    cdt = w1_ref.dtype  # MXU operand dtype (bf16 by default, f32 optional)
    x = x_ref[...].astype(cdt)
    # Layer 1: Linear + ReLU (f32 MXU accumulation, f32 VPU elementwise)
    h = jnp.dot(x, w1_ref[...], preferred_element_type=jnp.float32) + b1_ref[...]
    h = jnp.maximum(h, 0.0)
    # Layer 2: Linear + ReLU
    h = jnp.dot(h.astype(cdt), w2_ref[...],
                preferred_element_type=jnp.float32) + b2_ref[...]
    h = jnp.maximum(h, 0.0)
    # Layer 3: Linear (quantile head, true Q lanes)
    out = jnp.dot(h.astype(cdt), w3_ref[...],
                  preferred_element_type=jnp.float32) + b3_ref[...]
    o_ref[...] = out.astype(o_ref.dtype)


def quantile_function_forward(x, params, *, batch_tile: int = 1024):
    """QuantileFunction MLP forward pass in one Pallas kernel.

    x: [batch, state_dim + action_dim] float32
    params: dict from init_quantile_function_params (kernel weights under *_k).
    returns: [batch, nr_quantiles] float32
    """
    if x.dtype != jnp.float32:
        x = x.astype(jnp.float32)
    B, Din = x.shape
    w1, b1 = params["w1_k"], params["b1_k"]
    w2, b2 = params["w2_k"], params["b2_k"]
    w3, b3 = params["w3_k"], params["b3_k"]
    assert w1.shape[0] == Din, "input feature dim mismatch"
    H_p = w1.shape[1]
    Q = w3.shape[1]

    # Batch tile: multiple of 8 sublanes, capped at batch_tile. No row padding:
    # Pallas clips the ragged last block on writeback.
    TB = min(batch_tile, _round_up(B, _SUBLANE))
    n_tiles = pl.cdiv(B, TB)
    # v7x megacore: give the "parallel" batch axis >= 2 grid steps for larger
    # batches so the second TensorCore is not idle.
    if n_tiles == 1 and B > 256:
        TB = _round_up(pl.cdiv(B, 2), _SUBLANE)
        n_tiles = pl.cdiv(B, TB)

    weight_bytes = sum(int(a.size) * jnp.dtype(a.dtype).itemsize
                       for a in (w1, b1, w2, b2, w3, b3))
    flops = 2 * B * (Din * H_p + H_p * H_p + H_p * Q)
    bytes_accessed = int(x.size) * 4 + weight_bytes + B * Q * 4

    return pl.pallas_call(
        _mlp_kernel,
        out_shape=jax.ShapeDtypeStruct((B, Q), jnp.float32),
        grid=(n_tiles,),
        in_specs=[
            pl.BlockSpec((TB, Din), lambda i: (i, 0)),     # x tile (pipelined)
            pl.BlockSpec((Din, H_p), lambda i: (0, 0)),    # weights: VMEM-resident
            pl.BlockSpec((1, H_p), lambda i: (0, 0)),
            pl.BlockSpec((H_p, H_p), lambda i: (0, 0)),
            pl.BlockSpec((1, H_p), lambda i: (0, 0)),
            pl.BlockSpec((H_p, Q), lambda i: (0, 0)),
            pl.BlockSpec((1, Q), lambda i: (0, 0)),
        ],
        out_specs=pl.BlockSpec((TB, Q), lambda i: (i, 0)),  # true-width output
        compiler_params=pltpu.CompilerParams(
            dimension_semantics=("parallel",)),
        cost_estimate=pl.CostEstimate(
            flops=flops, transcendentals=0, bytes_accessed=bytes_accessed),
    )(x, w1, b1, w2, b2, w3, b3)


def compute_quantiles(state, action, params, **kw):
    """Parity with QuantileFunction.compute_quantiles: concat then forward."""
    x = jnp.concatenate((state, action), axis=1)
    return quantile_function_forward(x, params, **kw)


def init_quantile_function_params(key, state_dim, action_dim, hidden_size,
                                  nr_quantiles, q_start=0.0, q_end=1.0,
                                  param_dtype=jnp.bfloat16):
    """Deterministic init mirroring QuantileFunction.__init__ shapes.

    Returns true-shape f32 weights (w1..b3, for the reference) plus kernel
    copies (w1_k..b3_k): hidden dim zero-padded to 128, matmul operands cast
    to `param_dtype` (bf16 by default for the native MXU path), biases in f32.
    """
    assert 0 <= q_start < q_end <= 1.0
    in_dim = state_dim + action_dim
    keys = jax.random.split(key, 6)

    def linear_init(kw_, kb_, fan_in, fan_out):
        # PyTorch nn.Linear default: U(-1/sqrt(fan_in), 1/sqrt(fan_in))
        bound = 1.0 / math.sqrt(fan_in)
        w = jax.random.uniform(kw_, (fan_in, fan_out), jnp.float32, -bound, bound)
        b = jax.random.uniform(kb_, (1, fan_out), jnp.float32, -bound, bound)
        return w, b

    w1, b1 = linear_init(keys[0], keys[1], in_dim, hidden_size)
    w2, b2 = linear_init(keys[2], keys[3], hidden_size, hidden_size)
    w3, b3 = linear_init(keys[4], keys[5], hidden_size, nr_quantiles)

    H_p = _round_up(hidden_size, _LANE)

    def pad2(a, r, c):
        return jnp.pad(a, ((0, r - a.shape[0]), (0, c - a.shape[1])))

    # Hidden-dim padding only (numerically inert); Din and Q stay true-width.
    w1_k = pad2(w1, in_dim, H_p).astype(param_dtype)
    b1_k = pad2(b1, 1, H_p)
    w2_k = pad2(w2, H_p, H_p).astype(param_dtype)
    b2_k = pad2(b2, 1, H_p)
    w3_k = pad2(w3, H_p, nr_quantiles).astype(param_dtype)
    b3_k = b3

    # Non-learnable buffers from __init__ (not used in forward, kept for parity).
    linspace = jnp.linspace(q_start, q_end, nr_quantiles + 1)
    quantile_locations = (linspace[:-1] + linspace[1:]) / 2.0
    probability_mass = jnp.diff(linspace)
    b_buf = jnp.array([1.0], jnp.float32)

    return {
        "w1": w1, "b1": b1, "w2": w2, "b2": b2, "w3": w3, "b3": b3,
        "w1_k": w1_k, "b1_k": b1_k, "w2_k": w2_k, "b2_k": b2_k,
        "w3_k": w3_k, "b3_k": b3_k,
        "nr_quantiles": nr_quantiles, "in_dim": in_dim,
        "quantile_locations": quantile_locations,
        "probability_mass": probability_mass,
        "b": b_buf,
    }


def _reference_forward(x, p, cast_dtype=None, precision=None):
    """Pure-JAX reference. cast_dtype=bf16 mimics the kernel's operand dtype."""
    def lin(a, w, b):
        if cast_dtype is not None:
            a = a.astype(cast_dtype)
            w = w.astype(cast_dtype)
        return jnp.dot(a, w, preferred_element_type=jnp.float32,
                       precision=precision) + b
    h1 = jnp.maximum(lin(x, p["w1"], p["b1"]), 0.0)
    h2 = jnp.maximum(lin(h1, p["w2"], p["b2"]), 0.0)
    return lin(h2, p["w3"], p["b3"])


if __name__ == "__main__":
    # Small, module-consistent shapes.
    batch = 8
    state_dim = 24
    action_dim = 8
    hidden_size = 32
    nr_quantiles = 16

    key = jax.random.PRNGKey(0)
    pkey, xkey, xkey2 = jax.random.split(key, 3)

    # --- f32-operand path, single grid step ---
    params_f32 = init_quantile_function_params(
        pkey, state_dim, action_dim, hidden_size, nr_quantiles,
        q_start=0.0, q_end=1.0, param_dtype=jnp.float32)
    x = jax.random.normal(xkey, (batch, state_dim + action_dim), jnp.float32)
    out = jax.block_until_ready(quantile_function_forward(x, params_f32))
    ref = _reference_forward(x, params_f32, precision="highest")
    assert out.shape == (batch, nr_quantiles)
    assert jnp.allclose(out, ref, atol=5e-3, rtol=5e-3), "f32 path mismatch"

    # --- bf16-operand path (default), ragged grid (batch not multiple of tile) ---
    params = init_quantile_function_params(
        pkey, state_dim, action_dim, hidden_size, nr_quantiles,
        q_start=0.0, q_end=1.0)  # param_dtype=bf16
    big_batch = 200
    x2 = jax.random.normal(xkey2, (big_batch, state_dim + action_dim), jnp.float32)
    out2 = jax.block_until_ready(
        quantile_function_forward(x2, params, batch_tile=64))
    ref2_bf16 = _reference_forward(x2, params, cast_dtype=jnp.bfloat16)
    ref2_f32 = _reference_forward(x2, params, precision="highest")
    assert out2.shape == (big_batch, nr_quantiles)
    assert jnp.allclose(out2, ref2_bf16, atol=2e-3, rtol=2e-3), \
        "bf16 path mismatch vs bf16 reference"
    assert jnp.allclose(out2, ref2_f32, atol=3e-2, rtol=3e-2), \
        "bf16 path too far from f32 reference"

    # compute_quantiles parity path (concat outside the kernel).
    s = x2[:, :state_dim]
    a = x2[:, state_dim:]
    out3 = jax.block_until_ready(compute_quantiles(s, a, params, batch_tile=64))
    assert jnp.allclose(out3, out2)

    print("KERNEL_OK")
</pallas_src>

<mosaic_0001>
module attributes {stable_mosaic.version = 11 : i64} {
  func.func @_mlp_kernel(%arg0: i32, %arg1: memref<8x32xf32, #tpu.memory_space<vmem>>, %arg2: memref<32x128xf32, #tpu.memory_space<vmem>>, %arg3: memref<1x128xf32, #tpu.memory_space<vmem>>, %arg4: memref<128x128xf32, #tpu.memory_space<vmem>>, %arg5: memref<1x128xf32, #tpu.memory_space<vmem>>, %arg6: memref<128x16xf32, #tpu.memory_space<vmem>>, %arg7: memref<1x16xf32, #tpu.memory_space<vmem>>, %arg8: memref<8x16xf32, #tpu.memory_space<vmem>>) attributes {dimension_semantics = [#tpu.dimension_semantics<parallel>], iteration_bounds = array<i64: 1>, scalar_prefetch = 0 : i64, scratch_operands = 0 : i64, tpu.core_type = #tpu.core_type<tc>, window_params = [{transform_indices = @transform_0, window_bounds = array<i64: 8, 32>}, {pipeline_mode = #tpu.pipeline_mode<synchronous>, transform_indices = @transform_1, window_bounds = array<i64: 32, 128>}, {pipeline_mode = #tpu.pipeline_mode<synchronous>, transform_indices = @transform_2, window_bounds = array<i64: 1, 128>}, {pipeline_mode = #tpu.pipeline_mode<synchronous>, transform_indices = @transform_3, window_bounds = array<i64: 128, 128>}, {pipeline_mode = #tpu.pipeline_mode<synchronous>, transform_indices = @transform_4, window_bounds = array<i64: 1, 128>}, {pipeline_mode = #tpu.pipeline_mode<synchronous>, transform_indices = @transform_5, window_bounds = array<i64: 128, 16>}, {pipeline_mode = #tpu.pipeline_mode<synchronous>, transform_indices = @transform_6, window_bounds = array<i64: 1, 16>}, {transform_indices = @transform_7, window_bounds = array<i64: 8, 16>}]} {
    %c0 = arith.constant 0 : index
    %c0_0 = arith.constant 0 : index
    %0 = vector.load %arg1[%c0, %c0_0] : memref<8x32xf32, #tpu.memory_space<vmem>>, vector<8x32xf32>
    %c0_1 = arith.constant 0 : index
    %c0_2 = arith.constant 0 : index
    %1 = vector.load %arg2[%c0_1, %c0_2] : memref<32x128xf32, #tpu.memory_space<vmem>>, vector<32x128xf32>
    %cst = arith.constant dense<0.000000e+00> : vector<8x128xf32>
    %2 = tpu.matmul %0, %1, %cst {dimension_numbers = #tpu.dot_dimension_numbers<[1], [0], [0], [1], [0, 0, 1, 1], [], []>} : vector<8x32xf32>, vector<32x128xf32>, vector<8x128xf32> -> vector<8x128xf32>
    %c0_3 = arith.constant 0 : index
    %c0_4 = arith.constant 0 : index
    %3 = vector.load %arg3[%c0_3, %c0_4] : memref<1x128xf32, #tpu.memory_space<vmem>>, vector<1x128xf32>
    %4 = vector.broadcast %3 : vector<1x128xf32> to vector<8x128xf32>
    %5 = arith.addf %2, %4 : vector<8x128xf32>
    %cst_5 = arith.constant 0.000000e+00 : f32
    %6 = vector.broadcast %cst_5 : f32 to vector<8x128xf32>
    %7 = arith.maximumf %5, %6 : vector<8x128xf32>
    %c0_6 = arith.constant 0 : index
    %c0_7 = arith.constant 0 : index
    %8 = vector.load %arg4[%c0_6, %c0_7] : memref<128x128xf32, #tpu.memory_space<vmem>>, vector<128x128xf32>
    %cst_8 = arith.constant dense<0.000000e+00> : vector<8x128xf32>
    %9 = tpu.matmul %7, %8, %cst_8 {dimension_numbers = #tpu.dot_dimension_numbers<[1], [0], [0], [1], [0, 0, 1, 1], [], []>} : vector<8x128xf32>, vector<128x128xf32>, vector<8x128xf32> -> vector<8x128xf32>
    %c0_9 = arith.constant 0 : index
    %c0_10 = arith.constant 0 : index
    %10 = vector.load %arg5[%c0_9, %c0_10] : memref<1x128xf32, #tpu.memory_space<vmem>>, vector<1x128xf32>
    %11 = vector.broadcast %10 : vector<1x128xf32> to vector<8x128xf32>
    %12 = arith.addf %9, %11 : vector<8x128xf32>
    %cst_11 = arith.constant 0.000000e+00 : f32
    %13 = vector.broadcast %cst_11 : f32 to vector<8x128xf32>
    %14 = arith.maximumf %12, %13 : vector<8x128xf32>
    %c0_12 = arith.constant 0 : index
    %c0_13 = arith.constant 0 : index
    %15 = vector.load %arg6[%c0_12, %c0_13] : memref<128x16xf32, #tpu.memory_space<vmem>>, vector<128x16xf32>
    %cst_14 = arith.constant dense<0.000000e+00> : vector<8x16xf32>
    %16 = tpu.matmul %14, %15, %cst_14 {dimension_numbers = #tpu.dot_dimension_numbers<[1], [0], [0], [1], [0, 0, 1, 1], [], []>} : vector<8x128xf32>, vector<128x16xf32>, vector<8x16xf32> -> vector<8x16xf32>
    %c0_15 = arith.constant 0 : index
    %c0_16 = arith.constant 0 : index
    %17 = vector.load %arg7[%c0_15, %c0_16] : memref<1x16xf32, #tpu.memory_space<vmem>>, vector<1x16xf32>
    %18 = vector.broadcast %17 : vector<1x16xf32> to vector<8x16xf32>
    %19 = arith.addf %16, %18 : vector<8x16xf32>
    %c0_17 = arith.constant 0 : index
    %c0_18 = arith.constant 0 : index
    %20 = vector.load %arg8[%c0_17, %c0_18] : memref<8x16xf32, #tpu.memory_space<vmem>>, vector<8x16xf32>
    tpu.vector_store %arg8[%c0_17, %c0_18], %19 {strides = array<i32>} : memref<8x16xf32, #tpu.memory_space<vmem>>, vector<8x16xf32>,
    return
  }
  func.func @transform_0(%arg0: i32) -> (i32, i32) {
    %c0_i32 = arith.constant 0 : i32
    %c0_i32_0 = arith.constant 0 : i32
    return %arg0, %c0_i32 : i32, i32
  }
  func.func @transform_1(%arg0: i32) -> (i32, i32) {
    %c0_i32 = arith.constant 0 : i32
    %c0_i32_0 = arith.constant 0 : i32
    %c0_i32_1 = arith.constant 0 : i32
    return %c0_i32, %c0_i32_0 : i32, i32
  }
  func.func @transform_2(%arg0: i32) -> (i32, i32) {
    %c0_i32 = arith.constant 0 : i32
    %c0_i32_0 = arith.constant 0 : i32
    %c0_i32_1 = arith.constant 0 : i32
    return %c0_i32, %c0_i32_0 : i32, i32
  }
  func.func @transform_3(%arg0: i32) -> (i32, i32) {
    %c0_i32 = arith.constant 0 : i32
    %c0_i32_0 = arith.constant 0 : i32
    %c0_i32_1 = arith.constant 0 : i32
    return %c0_i32, %c0_i32_0 : i32, i32
  }
  func.func @transform_4(%arg0: i32) -> (i32, i32) {
    %c0_i32 = arith.constant 0 : i32
    %c0_i32_0 = arith.constant 0 : i32
    %c0_i32_1 = arith.constant 0 : i32
    return %c0_i32, %c0_i32_0 : i32, i32
  }
  func.func @transform_5(%arg0: i32) -> (i32, i32) {
    %c0_i32 = arith.constant 0 : i32
    %c0_i32_0 = arith.constant 0 : i32
    %c0_i32_1 = arith.constant 0 : i32
    return %c0_i32, %c0_i32_0 : i32, i32
  }
  func.func @transform_6(%arg0: i32) -> (i32, i32) {
    %c0_i32 = arith.constant 0 : i32
    %c0_i32_0 = arith.constant 0 : i32
    %c0_i32_1 = arith.constant 0 : i32
    return %c0_i32, %c0_i32_0 : i32, i32
  }
  func.func @transform_7(%arg0: i32) -> (i32, i32) {
    %c0_i32 = arith.constant 0 : i32
    %c0_i32_0 = arith.constant 0 : i32
    return %arg0, %c0_i32 : i32, i32
  }
}

</mosaic_0001>

<bundles_post_ra>
// kernel: tpu_custom_call.1
= control target key start
LH: loop header
LB: loop body
LE: loop exit
PB: predicated region body
PF: predicated region fallthrough
CT: control target
= control target key end

     0   :  { %12 = vsyncpa [#allocation3], 0  ;;  %s395_s0 = inlined_call_operand.vmem [shape: f32[8,32], index: 0, kind: input, shape index: {}]   ;;  %s396_s1 = inlined_call_operand.hbm [shape: f32[32,128], index: 1, kind: input, shape index: {}]   ;;  %s397_s2 = inlined_call_operand.vmem [shape: f32[1,128], index: 2, kind: input, shape index: {}]   ;;  %s398_s3 = inlined_call_operand.vmem [shape: f32[128,128], index: 3, kind: input, shape index: {}]   ;;  %s399_s4 = inlined_call_operand.vmem [shape: f32[1,128], index: 4, kind: input, shape index: {}]   ;;  %s400_s5 = inlined_call_operand.vmem [shape: f32[128,16], index: 5, kind: input, shape index: {}]   ;;  %s401_s6 = inlined_call_operand.vmem [shape: f32[1,16], index: 6, kind: input, shape index: {}]   ;;  %s402_s7 = inlined_call_operand.hbm [shape: f32[8,16], index: 7, kind: output, shape index: {}]  }
   0x1   :  { %13 = vsyncpa [#allocation4], 0  ;;  %s20_s26 = sshll.u32 %s396_s1, 4  ;;  %s237_s27 = smov [#allocation2]   ;;  %s21_s26 = int_to_ptr.hbm [resolvable:$true] %s20_s26 }
   0x2   :  { %s22_s28 = sshll.u32 %s237_s27, 4  ;;  %s238_s29 = smov 128   ;;  %s23_s28 = int_to_ptr.vmem [resolvable:$true] %s22_s28 }
   0x3   :  { %s239_s30 = smov 8  }
   0x4   :  { %28 = dma.hbm_to_vmem [thread:$0]  %s21_s26, 512, %s23_s28, [#allocation3], %s238_s29, %s238_s29, %s239_s30  }
   0x5   :  { %233 = dma.done.wait [#allocation3], 512  }
   0x6   :  { %234 = vsyncadd [#allocation3], 4294966784  ;;  %v47_v0 = vld [vmem:[#allocation2 + $0x18] sm:$0xff]  ;;  %v46_v1 = vld [vmem:[#allocation2 + $0x10] sm:$0xff]  ;;  %vm52_vm0 = vcmask 261120   ;;  %s240_s25 = smov [#allocation5]  }
   0x7   :  { %68 = vmatpush.msra.mxu0 %v47_v0  ;;  %v92_v2 = vld [vmem:[%s398_s3 + $0x78] sm:$0xff]  ;;  %v45_v3 = vld [vmem:[#allocation2 + $0x8] sm:$0xff]  ;;  %v91_v4 = vld [vmem:[%s398_s3 + $0x70] sm:$0xff]  ;;  %s165_s26 = sshll.u32 %s240_s25, 4  ;;  %s167_s29 = sshll.u32 %s402_s7, 4  ;;  %vm158_vm1 = vcmask 130048   ;;  %s166_s26 = int_to_ptr.vmem [resolvable:$true] %s165_s26  ;;  %s168_s29 = int_to_ptr.hbm [resolvable:$true] %s167_s29 }
   0x8   :  { %97 = vmatpush.msra.mxu1 %v92_v2  ;;  %v90_v5 = vld [vmem:[%s398_s3 + $0x68] sm:$0xff]  ;;  %v44_v6 = vld [vmem:[#allocation2] sm:$0xff]  ;;  %v88_v9 = vld [vmem:[%s398_s3 + $0x58] sm:$0xff] }
   0x9   :  { %69 = vmatpush.msra.mxu0 %v46_v1  ;;  %v43_v7 = vld [vmem:[%s395_s0] sm:$0xff]  ;;  %v87_v10 = vld [vmem:[%s398_s3 + $0x50] sm:$0xff]  ;;  %v86_v11 = vld [vmem:[%s398_s3 + $0x48] sm:$0xff] }
   0xa   :  { %98 = vmatpush.msra.mxu1 %v91_v4  ;;  %v89_v8 = vld [vmem:[%s398_s3 + $0x60] sm:$0xff]  ;;  %v84_v13 = vld [vmem:[%s398_s3 + $0x38] sm:$0xff]  ;;  %v83_v14 = vld [vmem:[%s398_s3 + $0x30] sm:$0xff] }
   0xb   :  { %70 = vmatpush.msra.mxu0 %v45_v3  ;;  %v85_v12 = vld [vmem:[%s398_s3 + $0x40] sm:$0xff]  ;;  %v82_v15 = vld [vmem:[%s398_s3 + $0x28] sm:$0xff]  ;;  %v80_v17 = vld [vmem:[%s398_s3 + $0x18] sm:$0xff] }
   0xc   :  { %99 = vmatpush.msra.mxu1 %v90_v5  ;;  %v81_v16 = vld [vmem:[%s398_s3 + $0x20] sm:$0xff]  ;;  %v79_v18 = vld [vmem:[%s398_s3 + $0x10] sm:$0xff]  ;;  %v78_v19 = vld [vmem:[%s398_s3 + $0x8] sm:$0xff] }
   0xd   :  { %71 = vmatpush.msra.mxu0 %v44_v6  ;;  %v77_v20 = vld [vmem:[%s398_s3] sm:$0xff]  ;;  %v133_v21 = vld [vmem:[%s400_s5 + $0x78] sm:$0xff]  ;;  %v132_v22 = vld [vmem:[%s400_s5 + $0x70] sm:$0xff] }
   0xe   :  { %177 = vmatmul.msk.f32.vlgmr.msra.gmra.mxu0 %vm52_vm0, %v43_v7  ;;  %100 = vmatpush.msra.mxu1 %v89_v8  ;;  %v131_v23 = vld [vmem:[%s400_s5 + $0x68] sm:$0xff]  ;;  %v130_v24 = vld [vmem:[%s400_s5 + $0x60] sm:$0xff]  ;;  %v129_v25 = vld [vmem:[%s400_s5 + $0x58] sm:$0xff] }
   0xf   :  { %138 = vmatpush.msra.mxu2 %v133_v21  ;;  %v128_v26 = vld [vmem:[%s400_s5 + $0x50] sm:$0xff]  ;;  %v127_v27 = vld [vmem:[%s400_s5 + $0x48] sm:$0xff]  ;;  %v126_v28 = vld [vmem:[%s400_s5 + $0x40] sm:$0xff] }
  0x10   :  { %101 = vmatpush.msra.mxu1 %v88_v9  ;;  %v125_v29 = vld [vmem:[%s400_s5 + $0x38] sm:$0xff]  ;;  %v124_v30 = vld [vmem:[%s400_s5 + $0x30] sm:$0xff]  ;;  %v123_v31 = vld [vmem:[%s400_s5 + $0x28] sm:$0xff] }
  0x11   :  { %139 = vmatpush.msra.mxu2 %v132_v22  ;;  %v122_v32 = vld [vmem:[%s400_s5 + $0x20] sm:$0xff]  ;;  %v121_v33 = vld [vmem:[%s400_s5 + $0x18] sm:$0xff]  ;;  %v120_v38 = vld [vmem:[%s400_s5 + $0x10] sm:$0xff] }
  0x12   :  { %102 = vmatpush.msra.mxu1 %v87_v10  ;;  %v182_v34 = vld [vmem:[%s397_s2] ss:$0 sm:$0xff]  ;;  %v119_v39 = vld [vmem:[%s400_s5 + $0x8] sm:$0xff] }
  0x13   :  { %140 = vmatpush.msra.mxu2 %v131_v23  ;;  %v118_v40 = vld [vmem:[%s400_s5] sm:$0xff] }
  0x14   :  { %103 = vmatpush.msra.mxu1 %v86_v11  ;;  %v183_v41 = vld [vmem:[%s399_s4] ss:$0 sm:$0xff] }
  0x15   :  { %141 = vmatpush.msra.mxu2 %v130_v24  ;;  %v184_v45 = vld [vmem:[%s401_s6] ss:$0 sm:$0xff] }
  0x16   :  { %104 = vmatpush.msra.mxu1 %v85_v12 }
  0x17   :  { %142 = vmatpush.msra.mxu2 %v129_v25 }
  0x18   :  { %105 = vmatpush.msra.mxu1 %v84_v13 }
  0x19   :  { %143 = vmatpush.msra.mxu2 %v128_v26 }
  0x1a   :  { %106 = vmatpush.msra.mxu1 %v83_v14 }
  0x1b   :  { %144 = vmatpush.msra.mxu2 %v127_v27 }
  0x1c   :  { %107 = vmatpush.msra.mxu1 %v82_v15 }
  0x1d   :  { %145 = vmatpush.msra.mxu2 %v126_v28 }
  0x1e   :  { %108 = vmatpush.msra.mxu1 %v81_v16 }
  0x1f   :  { %146 = vmatpush.msra.mxu2 %v125_v29 }
  0x20   :  { %109 = vmatpush.msra.mxu1 %v80_v17 }
  0x21   :  { %147 = vmatpush.msra.mxu2 %v124_v30 }
  0x22   :  { %110 = vmatpush.msra.mxu1 %v79_v18 }
  0x23   :  { %148 = vmatpush.msra.mxu2 %v123_v31 }
  0x24   :  { %111 = vmatpush.msra.mxu1 %v78_v19 }
  0x25   :  { %149 = vmatpush.msra.mxu2 %v122_v32 }
  0x26   :  { %112 = vmatpush.msra.mxu1 %v77_v20 }
  0x27   :  { %150 = vmatpush.msra.mxu2 %v121_v33 }
  0x29   :  { %151 = vmatpush.msra.mxu2 %v120_v38 }
  0x2b   :  { %152 = vmatpush.msra.mxu2 %v119_v39 }
  0x2d   :  { %153 = vmatpush.msra.mxu2 %v118_v40 }
  0x8b   :  { %v73_v35 = vpop.f32.mrf.mxu0 }
  0x8c   :  { %v74_v36 = vadd.f32 %v182_v34, %v73_v35 }
  0x8e   :  { %v76_v37 = vmax.f32 %v74_v36, 0.0 }
  0x90   :  { %113 = vmatmul.f32.vlgmr.msra.gmra.mxu1 %v76_v37 }
 0x10d   :  { %v114_v42 = vpop.f32.mrf.mxu1 }
 0x10e   :  { %v115_v43 = vadd.f32 %v183_v41, %v114_v42 }
 0x110   :  { %v117_v44 = vmax.f32 %v115_v43, 0.0 }
 0x112   :  { %154 = vmatmul.f32.vlgmr.msra.gmra.mxu2 %v117_v44 }
 0x195   :  { %v155_v46 = vpop.f32.mrf.mxu2 }
 0x196   :  { %v156_v47 = vadd.f32 %v184_v45, %v155_v46 }
 0x198   :  { %159 = vst.msk [vmem:[#allocation5] sm:$0xff] %vm158_vm1, %v156_v47 }
 0x199   :  { %170 = dma.vmem_to_hbm [thread:$0]  %s166_s26, 128, %s168_s29, [#allocation4]  }
 0x19a   :  { %235 = dma.done.wait [#allocation4], 128  }
 0x19b   :  { %236 = vsyncadd [#allocation4], 4294967168 }
 0x19c   :  { %175 = vsyncpa [#allocation3], 1 }
 0x19d   :  { %176 = vsyncpa [#allocation4], 1 }

</bundles_post_ra>
